<compile_context>
chip_gen: v5e
topology: v5e:2x2
jax: 0.10.0
libtpu: 0.0.40
codegen_flags: <defaults>
</compile_context>

<pallas_src>
import jax
import jax.numpy as jnp
from jax.experimental import pallas as pl
from jax.experimental.pallas import tpu as pltpu


def _lsr(v, n):
    """Logical right shift on int32 (arithmetic shift + mask) - Mosaic/interp safe."""
    return (v >> n) & jnp.int32((1 << (32 - n)) - 1)


def rasd_kernel(seed_ref, nvalid_ref, vals_ref, idx_ref):
    """seed_ref:   SMEM (1,)   int32   scalar seed
       nvalid_ref: VMEM (KP,1) int32   per-row number of valid factors (>=1)
       vals_ref:   VMEM (KP,NPAD) f32  row k, lanes [0, n_k) = softmax(rand(n_k))
       idx_ref:    VMEM (KP,128) int32 row k = argmax lane index (broadcast)"""
    kp, npad = vals_ref.shape
    seed = seed_ref[0]

    row = jax.lax.broadcasted_iota(jnp.int32, (kp, npad), 0)
    col = jax.lax.broadcasted_iota(jnp.int32, (kp, npad), 1)

    # TODO(synk): torch.rand's CPU RNG stream is replaced by a seeded integer-hash
    # PRNG (murmur3-style finalizer) -- same per-factor uniform distribution,
    # different concrete random values.
    x = seed + row * jnp.int32(-1640531527) + (col + 1) * jnp.int32(-2048144789)
    x = x ^ _lsr(x, 16)
    x = x * jnp.int32(-2048144789)   # 0x85EBCA6B
    x = x ^ _lsr(x, 13)
    x = x * jnp.int32(-1028477379)   # 0xC2B2AE35
    x = x ^ _lsr(x, 16)
    # uniform [0, 1) from the top 23 bits
    u = _lsr(x, 9).astype(jnp.float32) * jnp.float32(1.0 / (1 << 23))

    # mask lanes >= n_valid so they contribute exp(-inf) = 0 to the softmax
    nv = nvalid_ref[...]                       # (KP, 1), broadcasts along lanes
    masked = jnp.where(col < nv, u, -jnp.inf)

    # numerically-stable, exact softmax along lanes
    m = jnp.max(masked, axis=-1, keepdims=True)
    e = jnp.exp(masked - m)
    s = jnp.sum(e, axis=-1, keepdims=True)
    vals_ref[...] = e / s

    # fused argmax: smallest lane index achieving the row maximum
    cand = jnp.where(masked == m, col.astype(jnp.float32), jnp.float32(npad))
    idx = jnp.min(cand, axis=-1, keepdims=True).astype(jnp.int32)   # (KP, 1)
    idx_ref[...] = jnp.broadcast_to(idx, idx_ref.shape)


def rasd_pallas_batch(seed, n_valid_list):
    """Batched RASD device work.

    seed:          (1,) int32 device array.
    n_valid_list:  per-decision factor counts (each >= 1).
    Returns (vals_padded [KP, NPAD] f32, idx_padded [KP, 128] int32); row k of
    vals_padded holds softmax(rand(n_k)) in lanes [0, n_k), idx_padded[k, 0] is
    the argmax lane index of that row.
    """
    K = len(n_valid_list)
    assert K >= 1 and all(int(n) >= 1 for n in n_valid_list)
    KP = ((K + 7) // 8) * 8                       # sublane-dense batch
    NPAD = ((max(n_valid_list) + 127) // 128) * 128   # lane-dense output width
    nvalid = jnp.asarray(list(n_valid_list) + [1] * (KP - K),
                         dtype=jnp.int32).reshape(KP, 1)
    return pl.pallas_call(
        rasd_kernel,
        out_shape=(jax.ShapeDtypeStruct((KP, NPAD), jnp.float32),
                   jax.ShapeDtypeStruct((KP, 128), jnp.int32)),
        in_specs=[pl.BlockSpec(memory_space=pltpu.MemorySpace.SMEM),
                  pl.BlockSpec(memory_space=pltpu.MemorySpace.VMEM)],
        out_specs=(pl.BlockSpec(memory_space=pltpu.MemorySpace.VMEM),
                   pl.BlockSpec(memory_space=pltpu.MemorySpace.VMEM)),
    )(seed, nvalid)


# ---------------- Python glue reproducing the reference module ----------------

def get_factor_lst(n):
    return [i for i in range(1, n + 1) if n % i == 0]


if __name__ == "__main__":
    # batch several RASD decisions in one kernel call (amortizes dispatch cost)
    extents = [12, 18, 64, 7]
    factor_lists = [get_factor_lst(e) for e in extents]   # e.g. 12 -> [1,2,3,4,6,12]
    n_valid = [len(f) for f in factor_lists]

    # deterministic seed derived from PRNGKey(0); kept as a device array
    # (no blocking host round-trip)
    seed = jax.random.randint(jax.random.PRNGKey(0), (1,), 0, 2**31 - 1,
                              dtype=jnp.int32)

    vals_pad, idx_pad = jax.block_until_ready(rasd_pallas_batch(seed, n_valid))

    # single D2H fetch; narrow per-decision views are taken lazily on host
    vals_np = jax.device_get(vals_pad)
    idx_np = jax.device_get(idx_pad)

    for k, (extent, factors) in enumerate(zip(extents, factor_lists)):
        nf = len(factors)
        vals_k = vals_np[k, :nf]                 # reference: vals
        idx_k = int(idx_np[k, 0])                # fused in-kernel argmax
        choice = factors[idx_k]                  # reference: factors[argmax(vals)]

        assert vals_k.shape == (nf,)
        assert abs(float(vals_k.sum()) - 1.0) < 1e-4      # exact normalization
        assert bool((vals_k > 0.0).all())
        assert float(abs(vals_np[k, nf:]).max(initial=0.0)) < 1e-12  # padding is zero
        assert 0 <= idx_k < nf
        assert float(vals_k[idx_k]) >= float(vals_k.max()) - 1e-7    # argmax consistent
        assert choice in factors and extent % choice == 0

    print("KERNEL_OK")
</pallas_src>

<mosaic_0001>
module attributes {stable_mosaic.version = 11 : i64} {
  func.func @rasd_kernel(%arg0: memref<1xi32, #tpu.memory_space<smem>>, %arg1: memref<8x1xi32, #tpu.memory_space<vmem>>, %arg2: memref<8x128xf32, #tpu.memory_space<vmem>>, %arg3: memref<8x128xi32, #tpu.memory_space<vmem>>) attributes {dimension_semantics = [], scalar_prefetch = 0 : i64, scratch_operands = 0 : i64, tpu.core_type = #tpu.core_type<tc>} {
    %c0 = arith.constant 0 : index
    %0 = memref.load %arg0[%c0] : memref<1xi32, #tpu.memory_space<smem>>
    %1 = tpu.iota {dimensions = array<i32: 0>} : vector<8x128xi32>
    %2 = tpu.iota {dimensions = array<i32: 1>} : vector<8x128xi32>
    %c-1640531527_i32 = arith.constant -1640531527 : i32
    %3 = vector.broadcast %c-1640531527_i32 : i32 to vector<8x128xi32>
    %4 = arith.muli %1, %3 : vector<8x128xi32>
    %5 = vector.broadcast %0 : i32 to vector<8x128xi32>
    %6 = arith.addi %5, %4 : vector<8x128xi32>
    %c1_i32 = arith.constant 1 : i32
    %7 = vector.broadcast %c1_i32 : i32 to vector<8x128xi32>
    %8 = arith.addi %2, %7 : vector<8x128xi32>
    %c-2048144789_i32 = arith.constant -2048144789 : i32
    %9 = vector.broadcast %c-2048144789_i32 : i32 to vector<8x128xi32>
    %10 = arith.muli %8, %9 : vector<8x128xi32>
    %11 = arith.addi %6, %10 : vector<8x128xi32>
    %c16_i32 = arith.constant 16 : i32
    %12 = vector.broadcast %c16_i32 : i32 to vector<8x128xi32>
    %13 = arith.shrsi %11, %12 : vector<8x128xi32>
    %c65535_i32 = arith.constant 65535 : i32
    %14 = vector.broadcast %c65535_i32 : i32 to vector<8x128xi32>
    %15 = arith.andi %13, %14 : vector<8x128xi32>
    %16 = arith.xori %11, %15 : vector<8x128xi32>
    %c-2048144789_i32_0 = arith.constant -2048144789 : i32
    %17 = vector.broadcast %c-2048144789_i32_0 : i32 to vector<8x128xi32>
    %18 = arith.muli %16, %17 : vector<8x128xi32>
    %c13_i32 = arith.constant 13 : i32
    %19 = vector.broadcast %c13_i32 : i32 to vector<8x128xi32>
    %20 = arith.shrsi %18, %19 : vector<8x128xi32>
    %c524287_i32 = arith.constant 524287 : i32
    %21 = vector.broadcast %c524287_i32 : i32 to vector<8x128xi32>
    %22 = arith.andi %20, %21 : vector<8x128xi32>
    %23 = arith.xori %18, %22 : vector<8x128xi32>
    %c-1028477379_i32 = arith.constant -1028477379 : i32
    %24 = vector.broadcast %c-1028477379_i32 : i32 to vector<8x128xi32>
    %25 = arith.muli %23, %24 : vector<8x128xi32>
    %c16_i32_1 = arith.constant 16 : i32
    %26 = vector.broadcast %c16_i32_1 : i32 to vector<8x128xi32>
    %27 = arith.shrsi %25, %26 : vector<8x128xi32>
    %c65535_i32_2 = arith.constant 65535 : i32
    %28 = vector.broadcast %c65535_i32_2 : i32 to vector<8x128xi32>
    %29 = arith.andi %27, %28 : vector<8x128xi32>
    %30 = arith.xori %25, %29 : vector<8x128xi32>
    %c9_i32 = arith.constant 9 : i32
    %31 = vector.broadcast %c9_i32 : i32 to vector<8x128xi32>
    %32 = arith.shrsi %30, %31 : vector<8x128xi32>
    %c8388607_i32 = arith.constant 8388607 : i32
    %33 = vector.broadcast %c8388607_i32 : i32 to vector<8x128xi32>
    %34 = arith.andi %32, %33 : vector<8x128xi32>
    %35 = arith.sitofp %34 : vector<8x128xi32> to vector<8x128xf32>
    %cst = arith.constant 1.1920929E-7 : f32
    %36 = vector.broadcast %cst : f32 to vector<8x128xf32>
    %37 = arith.mulf %35, %36 : vector<8x128xf32>
    %c0_3 = arith.constant 0 : index
    %c0_4 = arith.constant 0 : index
    %38 = vector.load %arg1[%c0_3, %c0_4] : memref<8x1xi32, #tpu.memory_space<vmem>>, vector<8x1xi32>
    %39 = vector.broadcast %38 : vector<8x1xi32> to vector<8x128xi32>
    %40 = arith.cmpi slt, %2, %39 : vector<8x128xi32>
    %cst_5 = arith.constant 0xFF800000 : f32
    %41 = vector.broadcast %cst_5 : f32 to vector<8x128xf32>
    %42 = arith.select %40, %37, %41 : vector<8x128xi1>, vector<8x128xf32>
    %cst_6 = arith.constant dense<0xFF800000> : vector<8xf32>
    %43 = vector.multi_reduction <maximumf>, %42, %cst_6 [1] : vector<8x128xf32> to vector<8xf32>
    %44 = vector.shape_cast %43 : vector<8xf32> to vector<8x1xf32>
    %45 = vector.broadcast %44 : vector<8x1xf32> to vector<8x128xf32>
    %46 = arith.subf %42, %45 : vector<8x128xf32>
    %47 = math.exp %46 : vector<8x128xf32>
    %cst_7 = arith.constant dense<0.000000e+00> : vector<8xf32>
    %48 = vector.multi_reduction <add>, %47, %cst_7 [1] : vector<8x128xf32> to vector<8xf32>
    %49 = vector.shape_cast %48 : vector<8xf32> to vector<8x1xf32>
    %50 = vector.broadcast %49 : vector<8x1xf32> to vector<8x128xf32>
    %51 = arith.divf %47, %50 : vector<8x128xf32>
    %c0_8 = arith.constant 0 : index
    %c0_9 = arith.constant 0 : index
    %52 = vector.load %arg2[%c0_8, %c0_9] : memref<8x128xf32, #tpu.memory_space<vmem>>, vector<8x128xf32>
    tpu.vector_store %arg2[%c0_8, %c0_9], %51 {strides = array<i32>} : memref<8x128xf32, #tpu.memory_space<vmem>>, vector<8x128xf32>,
    %53 = vector.broadcast %44 : vector<8x1xf32> to vector<8x128xf32>
    %54 = arith.cmpf oeq, %42, %53 : vector<8x128xf32>
    %55 = arith.sitofp %2 : vector<8x128xi32> to vector<8x128xf32>
    %cst_10 = arith.constant 1.280000e+02 : f32
    %56 = vector.broadcast %cst_10 : f32 to vector<8x128xf32>
    %57 = arith.select %54, %55, %56 : vector<8x128xi1>, vector<8x128xf32>
    %cst_11 = arith.constant dense<0x7F800000> : vector<8xf32>
    %58 = vector.multi_reduction <minimumf>, %57, %cst_11 [1] : vector<8x128xf32> to vector<8xf32>
    %59 = vector.shape_cast %58 : vector<8xf32> to vector<8x1xf32>
    %60 = arith.fptosi %59 : vector<8x1xf32> to vector<8x1xi32>
    %61 = vector.shape_cast %60 : vector<8x1xi32> to vector<8x1xi32>
    %62 = vector.broadcast %61 : vector<8x1xi32> to vector<8x128xi32>
    %c0_12 = arith.constant 0 : index
    %c0_13 = arith.constant 0 : index
    %63 = vector.load %arg3[%c0_12, %c0_13] : memref<8x128xi32, #tpu.memory_space<vmem>>, vector<8x128xi32>
    tpu.vector_store %arg3[%c0_12, %c0_13], %62 {strides = array<i32>} : memref<8x128xi32, #tpu.memory_space<vmem>>, vector<8x128xi32>,
    return
  }
}

</mosaic_0001>

<bundles_post_ra>
// kernel: tpu_custom_call.1
= control target key start
LH: loop header
LB: loop body
LE: loop exit
PB: predicated region body
PF: predicated region fallthrough
CT: control target
= control target key end

     0   :  { %10 = vsyncpa [#allocation4], 0  ;;  %s214_s0 = inlined_call_operand.<no memory space> [shape: s32[1], index: 0, kind: input, shape index: {}]   ;;  %s215_s1 = inlined_call_operand.vmem [shape: s32[8,1], index: 1, kind: input, shape index: {}]   ;;  %s216_s2 = inlined_call_operand.hbm [shape: f32[8,128], index: 2, kind: output, shape index: {0}]   ;;  %s217_s3 = inlined_call_operand.hbm [shape: s32[8,128], index: 3, kind: output, shape index: {1}]  }
   0x1   :  { %v42_v0 = vld [vmem:[%s215_s1] sm:$0xff] }
   0x2   :  { %11 = vsyncpa [#allocation6], 0  ;;  %v179_v1 = vmov 0   ;;  %v17_v2 = vlaneseq  ;;  %v22_v7 = vstv %s214_s0  ;;  %s180_s0 = smov [#allocation5]   ;;  %s96_s18 = sshll.u32 %s217_s3, 4  ;;  %s97_s18 = int_to_ptr.hbm [resolvable:$true] %s96_s18 }
   0x3   :  { %122 = vset.pattern.permute.xlu0 %v179_v1  ;;  %s94_s1 = sshll.u32 %s180_s0, 4  ;;  %s181_s19 = smov [#allocation3]   ;;  %s95_s1 = int_to_ptr.vmem [resolvable:$true] %s94_s1 }
   0x4   :  { %44 = vperm.xlu0 %122, %v42_v0   ;;  %v18_v3 = vshrl.u32 %v17_v2, 7  ;;  %v20_v4 = vand.u32 127, %v17_v2  ;;  %s83_s20 = sshll.u32 %s181_s19, 4  ;;  %s85_s23 = sshll.u32 %s216_s2, 4  ;;  %s84_s20 = int_to_ptr.vmem [resolvable:$true] %s83_s20  ;;  %s86_s23 = int_to_ptr.hbm [resolvable:$true] %s85_s23 }
   0x6   :  { %v21_v5 = vmul.u32 2654435769, %v18_v3  ;;  %v24_v6 = vadd.s32 1, %v20_v4  ;;  %v72_v28 = vcvt.s32.f32 %v20_v4 }
   0x8   :  { %v23_v8 = vadd.s32 %v22_v7, %v21_v5  ;;  %v25_v9 = vmul.u32 2246822507, %v24_v6 }
   0xa   :  { %v26_v10 = vadd.s32 %v25_v9, %v23_v8 }
   0xc   :  { %v110_v11 = vshrl.u32 %v26_v10, 16 }
   0xe   :  { %v29_v12 = vxor.u32 %v110_v11, %v26_v10 }
  0x10   :  { %v30_v13 = vmul.u32 2246822507, %v29_v12 }
  0x12   :  { %v111_v14 = vshrl.u32 %v30_v13, 13 }
  0x14   :  { %v33_v15 = vxor.u32 %v111_v14, %v30_v13 }
  0x16   :  { %v34_v16 = vmul.u32 3266489917, %v33_v15 }
  0x18   :  { %v112_v17 = vshrl.u32 %v34_v16, 16 }
  0x1a   :  { %v37_v18 = vxor.u32 %v112_v17, %v34_v16 }
  0x1c   :  { %v113_v19 = vshrl.u32 %v37_v18, 9 }
  0x1e   :  { %v40_v20 = vcvt.s32.f32 %v113_v19 }
  0x20   :  { %v41_v21 = vmul.f32 1.1920929e-07, %v40_v20 }
  0x76   :  { %v45_v22 = vpop.permute.xlu0 %44 }
  0x77   :  { %vm46_vm0 = vcmp.lt.s32.totalorder %v20_v4, %v45_v22 }
  0x78   :  { %v47_v23 = vsel %vm46_vm0, %v41_v21, -inf }
  0x79   :  { %48 = vmax.xlane.f32.xlu0 %v47_v23 }
  0xec   :  { %v49_v24 = vpop.xlane.xlu0 %48 }
  0xed   :  { %v50_v25 = vsub.f32 %v47_v23, %v49_v24  ;;  %vm71_vm1 = vcmp.eq.f32.partialorder %v47_v23, %v49_v24 }
  0xee   :  { %v73_v29 = vsel %vm71_vm1, %v72_v28, 128.0 }
  0xef   :  { %v51_v26 = vmul.f32 1.442695, %v50_v25 }
  0xf1   :  { %123 = vpow2.f32 %v51_v26 }
  0xf7   :  { %v124_v27 = vpop.eup %123 }
  0xf8   :  { %53 = vadd.xlane.f32.xlu1 %v124_v27 }
 0x100   :  { %74 = vmin.xlane.f32.xlu1 %v73_v29 }
 0x16b   :  { %v54_v30 = vpop.xlane.xlu1 %53 }
 0x16c   :  { %125 = vrcp.f32 %v54_v30  ;;  %v66_v38 = vand.u32 2147483648, %v54_v30  ;;  %v64_v40 = vand.u32 2147483647, %v54_v30  ;;  %vm60_vm4 = vweird.f32 %v54_v30 }
 0x16e   :  { %v67_v43 = vor.u32 1.1754944e-38, %v66_v38  ;;  %vm65_vm6 = vcmp.eq.f32.partialorder %v64_v40, 8.507059e+37 }
 0x172   :  { %v126_v31 = vpop.eup %125 }
 0x173   :  { %v56_v32 = vmul.f32 %v126_v31, %v54_v30  ;;  %v75_v33 = vpop.xlane.xlu1 %74  ;;  %vm61_vm3 = vweird.f32 %v126_v31 }
 0x174   :  { %vm114_vm2 = vcmp.lt.s32.totalorder %v75_v33, 0  ;;  %v115_v34 = vceil.f32 %v75_v33  ;;  %v116_v35 = vfloor.f32 %v75_v33  ;;  %vm62_vm5 = vmor %vm60_vm4, %vm61_vm3 }
 0x175   :  { %v57_v36 = vsub.f32 1.0, %v56_v32 }
 0x176   :  { %v117_v37 = vsel %vm114_vm2, %v115_v34, %v116_v35 }
 0x177   :  { %v58_v39 = vmul.f32 %v126_v31, %v57_v36  ;;  %v118_v41 = vcvt.f32.s32 %v117_v37 }
 0x179   :  { %v59_v42 = vadd.f32 %v126_v31, %v58_v39  ;;  %77 = vst [vmem:[#allocation5] sm:$0xff] %v118_v41 }
 0x17a   :  { %99 = dma.vmem_to_hbm [thread:$0]  %s95_s1, 128, %s97_s18, [#allocation6]  }
 0x17b   :  { %v63_v44 = vsel %vm62_vm5, %v126_v31, %v59_v42 }
 0x17c   :  { %v68_v45 = vsel %vm65_vm6, %v67_v43, %v63_v44 }
 0x17d   :  { %v69_v46 = vmul.f32 %v124_v27, %v68_v45 }
 0x17f   :  { %70 = vst [vmem:[#allocation3] sm:$0xff] %v69_v46 }
 0x180   :  { %88 = dma.vmem_to_hbm [thread:$0]  %s84_s20, 128, %s86_s23, [#allocation4]  }
 0x181   :  { %175 = dma.done.wait [#allocation4], 128  }
 0x182   :  { %176 = vsyncadd [#allocation4], 4294967168 }
 0x183   :  { %177 = dma.done.wait [#allocation6], 128  }
 0x184   :  { %178 = vsyncadd [#allocation6], 4294967168 }
 0x185   :  { %108 = vsyncpa [#allocation4], 1 }
 0x186   :  { %109 = vsyncpa [#allocation6], 1 }

</bundles_post_ra>
